<compile_context>
chip_gen: v6e
topology: v6e:2x2x1
jax: 0.10.0
libtpu: 0.0.40
codegen_flags: <defaults>
</compile_context>

<pallas_src>
import math

import jax
import jax.numpy as jnp
from jax.experimental import pallas as pl
from jax.experimental.pallas import tpu as pltpu

# ---------------- config --------------------------------------------------
Z_DIM      = 16    # cfg.GAN.Z_DIM
MANIFD_DIM = 16    # cfg.GAN.MANIFD_DIM
COND_DIM   = 8     # VC_NET(cond_dim=8)
BATCH      = 2
H1, H2     = 512, 256
BN_EPS     = 1e-5

_VMEM = pl.BlockSpec(memory_space=pltpu.MemorySpace.VMEM)


# ---------------- fused Pallas kernel --------------------------------------
def _vc_net_kernel(noise_ref, cond_ref,
                   w1n_ref, w1c_ref, b1_ref, g1_ref, be1_ref,
                   w2_ref, b2_ref, g2_ref, be2_ref,
                   w31_ref, b31_ref, w32_ref, b32_ref,
                   seed_ref,
                   c_ref, mu_ref, lv_ref, std_ref):
    """VC_NET: fc1+BN1d+ReLU -> fc2+BN1d+ReLU -> (fc31, fc32) -> reparam."""
    inv_b = 1.0 / noise_ref.shape[0]

    def bn_relu_train(y, g, b):
        # one-pass batch statistics (biased variance == torch training mode)
        m = jnp.sum(y, axis=0, keepdims=True) * inv_b
        ms = jnp.sum(y * y, axis=0, keepdims=True) * inv_b
        var = ms - m * m
        return jnp.maximum((y - m) * jax.lax.rsqrt(var + BN_EPS) * g + b, 0.0)

    # fc1 on the implicit concat [noise | cond]  (split-weight matmuls)
    h = (jnp.dot(noise_ref[...].astype(jnp.bfloat16), w1n_ref[...],
                 preferred_element_type=jnp.float32)
         + jnp.dot(cond_ref[...].astype(jnp.bfloat16), w1c_ref[...],
                   preferred_element_type=jnp.float32)
         + b1_ref[...])
    h = bn_relu_train(h, g1_ref[...], be1_ref[...])

    # fc2 + BN + ReLU
    h = jnp.dot(h.astype(jnp.bfloat16), w2_ref[...],
                preferred_element_type=jnp.float32) + b2_ref[...]
    h = bn_relu_train(h, g2_ref[...], be2_ref[...])

    # fc31 (mu), fc32 (logvar), reparameterize
    hb = h.astype(jnp.bfloat16)
    mu = jnp.dot(hb, w31_ref[...],
                 preferred_element_type=jnp.float32) + b31_ref[...]
    lv = jnp.dot(hb, w32_ref[...],
                 preferred_element_type=jnp.float32) + b32_ref[...]
    std = jnp.exp(0.5 * lv)

    mu_ref[...] = mu
    lv_ref[...] = lv
    std_ref[...] = std
    c_ref[...] = seed_ref[...] * std + mu           # seed.mul(std).add_(mu)


# ---------------- wrapper ---------------------------------------------------
def vc_net_forward(noise, cond, params, seed):
    """Returns (c, mu, logvar, std) exactly like VC_NET.forward."""
    B = noise.shape[0]
    return pl.pallas_call(
        _vc_net_kernel,
        out_shape=tuple(jax.ShapeDtypeStruct((B, MANIFD_DIM), jnp.float32)
                        for _ in range(4)),
        in_specs=[_VMEM] * 16,
        out_specs=tuple([_VMEM] * 4),
    )(noise, cond, *params, seed)


# ---------------- parameters ------------------------------------------------
def make_params(key):
    ks = iter(jax.random.split(key, 16))

    def nrm(shape, scale, dtype=jnp.float32):
        return (scale * jax.random.normal(next(ks), shape, jnp.float32)
                ).astype(dtype)

    s1 = 1.0 / math.sqrt(Z_DIM + COND_DIM)
    s2 = 1.0 / math.sqrt(H1)
    s3 = 1.0 / math.sqrt(H2)
    return (
        nrm((Z_DIM, H1), s1, jnp.bfloat16),      # fc1 weight rows for noise
        nrm((COND_DIM, H1), s1, jnp.bfloat16),   # fc1 weight rows for cond
        nrm((1, H1), 0.02),                      # fc1 bias
        1.0 + nrm((1, H1), 0.02),                # bn_fc1 gamma
        nrm((1, H1), 0.02),                      # bn_fc1 beta
        nrm((H1, H2), s2, jnp.bfloat16),         # fc2 weight
        nrm((1, H2), 0.02),                      # fc2 bias
        1.0 + nrm((1, H2), 0.02),                # bn_fc2 gamma
        nrm((1, H2), 0.02),                      # bn_fc2 beta
        nrm((H2, MANIFD_DIM), s3, jnp.bfloat16), # fc31 weight
        nrm((1, MANIFD_DIM), 0.02),              # fc31 bias
        nrm((H2, MANIFD_DIM), s3, jnp.bfloat16), # fc32 weight
        nrm((1, MANIFD_DIM), 0.02),              # fc32 bias
    )


# ---------------- pure-JAX reference (same math, for a sanity check) --------
def vc_net_reference(noise, cond, params, seed):
    (w1n, w1c, b1, g1, be1, w2, b2, g2, be2, w31, b31, w32, b32) = params

    def bn_relu(y, g, b):
        m = jnp.mean(y, axis=0, keepdims=True)
        var = jnp.mean(y * y, axis=0, keepdims=True) - m * m
        return jnp.maximum((y - m) * jax.lax.rsqrt(var + BN_EPS) * g + b, 0.0)

    h = (jnp.dot(noise.astype(jnp.bfloat16), w1n,
                 preferred_element_type=jnp.float32)
         + jnp.dot(cond.astype(jnp.bfloat16), w1c,
                   preferred_element_type=jnp.float32) + b1)
    h = bn_relu(h, g1, be1)
    h = jnp.dot(h.astype(jnp.bfloat16), w2,
                preferred_element_type=jnp.float32) + b2
    h = bn_relu(h, g2, be2)
    hb = h.astype(jnp.bfloat16)
    mu = jnp.dot(hb, w31, preferred_element_type=jnp.float32) + b31
    lv = jnp.dot(hb, w32, preferred_element_type=jnp.float32) + b32
    std = jnp.exp(0.5 * lv)
    return seed * std + mu, mu, lv, std


# ---------------- main -------------------------------------------------------
if __name__ == "__main__":
    key = jax.random.PRNGKey(0)
    kp, kn, kc, ksd = jax.random.split(key, 4)

    params = make_params(kp)
    noise = jax.random.normal(kn, (BATCH, Z_DIM), jnp.float32)
    cond = jax.random.normal(kc, (BATCH, COND_DIM), jnp.float32)
    # training mode -> seed ~ N(0, I)
    # TODO(synk): torch.randn RNG stream cannot be reproduced; seed drawn with
    # jax.random host-side (the truncnorm eval branch is never taken here).
    seed = jax.random.normal(ksd, (BATCH, MANIFD_DIM), jnp.float32)

    c, mu, logvar, std = vc_net_forward(noise, cond, params, seed)
    jax.block_until_ready((c, mu, logvar, std))

    assert c.shape == mu.shape == logvar.shape == std.shape \
        == (BATCH, MANIFD_DIM)

    cr, mur, lvr, stdr = vc_net_reference(noise, cond, params, seed)
    for got, ref in ((c, cr), (mu, mur), (logvar, lvr), (std, stdr)):
        assert bool(jnp.all(jnp.isfinite(got)))
        assert bool(jnp.allclose(got, ref, rtol=2e-2, atol=2e-2))

    print("KERNEL_OK")
</pallas_src>

<mosaic_0001>
module attributes {stable_mosaic.version = 11 : i64} {
  func.func @_vc_net_kernel(%arg0: memref<2x16xf32, #tpu.memory_space<vmem>>, %arg1: memref<2x8xf32, #tpu.memory_space<vmem>>, %arg2: memref<16x512xbf16, #tpu.memory_space<vmem>>, %arg3: memref<8x512xbf16, #tpu.memory_space<vmem>>, %arg4: memref<1x512xf32, #tpu.memory_space<vmem>>, %arg5: memref<1x512xf32, #tpu.memory_space<vmem>>, %arg6: memref<1x512xf32, #tpu.memory_space<vmem>>, %arg7: memref<512x256xbf16, #tpu.memory_space<vmem>>, %arg8: memref<1x256xf32, #tpu.memory_space<vmem>>, %arg9: memref<1x256xf32, #tpu.memory_space<vmem>>, %arg10: memref<1x256xf32, #tpu.memory_space<vmem>>, %arg11: memref<256x16xbf16, #tpu.memory_space<vmem>>, %arg12: memref<1x16xf32, #tpu.memory_space<vmem>>, %arg13: memref<256x16xbf16, #tpu.memory_space<vmem>>, %arg14: memref<1x16xf32, #tpu.memory_space<vmem>>, %arg15: memref<2x16xf32, #tpu.memory_space<vmem>>, %arg16: memref<2x16xf32, #tpu.memory_space<vmem>>, %arg17: memref<2x16xf32, #tpu.memory_space<vmem>>, %arg18: memref<2x16xf32, #tpu.memory_space<vmem>>, %arg19: memref<2x16xf32, #tpu.memory_space<vmem>>) attributes {dimension_semantics = [], scalar_prefetch = 0 : i64, scratch_operands = 0 : i64, tpu.core_type = #tpu.core_type<tc>} {
    %c0 = arith.constant 0 : index
    %c0_0 = arith.constant 0 : index
    %0 = vector.load %arg0[%c0, %c0_0] : memref<2x16xf32, #tpu.memory_space<vmem>>, vector<2x16xf32>
    %1 = arith.truncf %0 : vector<2x16xf32> to vector<2x16xbf16>
    %c0_1 = arith.constant 0 : index
    %c0_2 = arith.constant 0 : index
    %2 = vector.load %arg2[%c0_1, %c0_2] : memref<16x512xbf16, #tpu.memory_space<vmem>>, vector<16x512xbf16>
    %cst = arith.constant dense<0.000000e+00> : vector<2x512xf32>
    %3 = tpu.matmul %1, %2, %cst {dimension_numbers = #tpu.dot_dimension_numbers<[1], [0], [0], [1], [0, 0, 1, 1], [], []>} : vector<2x16xbf16>, vector<16x512xbf16>, vector<2x512xf32> -> vector<2x512xf32>
    %c0_3 = arith.constant 0 : index
    %c0_4 = arith.constant 0 : index
    %4 = vector.load %arg1[%c0_3, %c0_4] : memref<2x8xf32, #tpu.memory_space<vmem>>, vector<2x8xf32>
    %5 = arith.truncf %4 : vector<2x8xf32> to vector<2x8xbf16>
    %c0_5 = arith.constant 0 : index
    %c0_6 = arith.constant 0 : index
    %6 = vector.load %arg3[%c0_5, %c0_6] : memref<8x512xbf16, #tpu.memory_space<vmem>>, vector<8x512xbf16>
    %cst_7 = arith.constant dense<0.000000e+00> : vector<2x512xf32>
    %7 = tpu.matmul %5, %6, %cst_7 {dimension_numbers = #tpu.dot_dimension_numbers<[1], [0], [0], [1], [0, 0, 1, 1], [], []>} : vector<2x8xbf16>, vector<8x512xbf16>, vector<2x512xf32> -> vector<2x512xf32>
    %8 = arith.addf %3, %7 : vector<2x512xf32>
    %c0_8 = arith.constant 0 : index
    %c0_9 = arith.constant 0 : index
    %9 = vector.load %arg4[%c0_8, %c0_9] : memref<1x512xf32, #tpu.memory_space<vmem>>, vector<1x512xf32>
    %10 = vector.broadcast %9 : vector<1x512xf32> to vector<2x512xf32>
    %11 = arith.addf %8, %10 : vector<2x512xf32>
    %c0_10 = arith.constant 0 : index
    %c0_11 = arith.constant 0 : index
    %12 = vector.load %arg5[%c0_10, %c0_11] : memref<1x512xf32, #tpu.memory_space<vmem>>, vector<1x512xf32>
    %c0_12 = arith.constant 0 : index
    %c0_13 = arith.constant 0 : index
    %13 = vector.load %arg6[%c0_12, %c0_13] : memref<1x512xf32, #tpu.memory_space<vmem>>, vector<1x512xf32>
    %cst_14 = arith.constant dense<0.000000e+00> : vector<512xf32>
    %14 = vector.multi_reduction <add>, %11, %cst_14 [0] : vector<2x512xf32> to vector<512xf32>
    %15 = vector.shape_cast %14 : vector<512xf32> to vector<1x512xf32>
    %cst_15 = arith.constant 5.000000e-01 : f32
    %16 = vector.broadcast %cst_15 : f32 to vector<1x512xf32>
    %17 = arith.mulf %15, %16 : vector<1x512xf32>
    %18 = arith.mulf %11, %11 : vector<2x512xf32>
    %cst_16 = arith.constant dense<0.000000e+00> : vector<512xf32>
    %19 = vector.multi_reduction <add>, %18, %cst_16 [0] : vector<2x512xf32> to vector<512xf32>
    %20 = vector.shape_cast %19 : vector<512xf32> to vector<1x512xf32>
    %cst_17 = arith.constant 5.000000e-01 : f32
    %21 = vector.broadcast %cst_17 : f32 to vector<1x512xf32>
    %22 = arith.mulf %20, %21 : vector<1x512xf32>
    %23 = arith.mulf %17, %17 : vector<1x512xf32>
    %24 = arith.subf %22, %23 : vector<1x512xf32>
    %25 = vector.broadcast %17 : vector<1x512xf32> to vector<2x512xf32>
    %26 = arith.subf %11, %25 : vector<2x512xf32>
    %cst_18 = arith.constant 9.99999974E-6 : f32
    %27 = vector.broadcast %cst_18 : f32 to vector<1x512xf32>
    %28 = arith.addf %24, %27 : vector<1x512xf32>
    %29 = math.rsqrt %28 : vector<1x512xf32>
    %30 = vector.broadcast %29 : vector<1x512xf32> to vector<2x512xf32>
    %31 = arith.mulf %26, %30 : vector<2x512xf32>
    %32 = vector.broadcast %12 : vector<1x512xf32> to vector<2x512xf32>
    %33 = arith.mulf %31, %32 : vector<2x512xf32>
    %34 = vector.broadcast %13 : vector<1x512xf32> to vector<2x512xf32>
    %35 = arith.addf %33, %34 : vector<2x512xf32>
    %cst_19 = arith.constant 0.000000e+00 : f32
    %36 = vector.broadcast %cst_19 : f32 to vector<2x512xf32>
    %37 = arith.maximumf %35, %36 : vector<2x512xf32>
    %38 = arith.truncf %37 : vector<2x512xf32> to vector<2x512xbf16>
    %c0_20 = arith.constant 0 : index
    %c0_21 = arith.constant 0 : index
    %39 = vector.load %arg7[%c0_20, %c0_21] : memref<512x256xbf16, #tpu.memory_space<vmem>>, vector<512x256xbf16>
    %cst_22 = arith.constant dense<0.000000e+00> : vector<2x256xf32>
    %40 = tpu.matmul %38, %39, %cst_22 {dimension_numbers = #tpu.dot_dimension_numbers<[1], [0], [0], [1], [0, 0, 1, 1], [], []>} : vector<2x512xbf16>, vector<512x256xbf16>, vector<2x256xf32> -> vector<2x256xf32>
    %c0_23 = arith.constant 0 : index
    %c0_24 = arith.constant 0 : index
    %41 = vector.load %arg8[%c0_23, %c0_24] : memref<1x256xf32, #tpu.memory_space<vmem>>, vector<1x256xf32>
    %42 = vector.broadcast %41 : vector<1x256xf32> to vector<2x256xf32>
    %43 = arith.addf %40, %42 : vector<2x256xf32>
    %c0_25 = arith.constant 0 : index
    %c0_26 = arith.constant 0 : index
    %44 = vector.load %arg9[%c0_25, %c0_26] : memref<1x256xf32, #tpu.memory_space<vmem>>, vector<1x256xf32>
    %c0_27 = arith.constant 0 : index
    %c0_28 = arith.constant 0 : index
    %45 = vector.load %arg10[%c0_27, %c0_28] : memref<1x256xf32, #tpu.memory_space<vmem>>, vector<1x256xf32>
    %cst_29 = arith.constant dense<0.000000e+00> : vector<256xf32>
    %46 = vector.multi_reduction <add>, %43, %cst_29 [0] : vector<2x256xf32> to vector<256xf32>
    %47 = vector.shape_cast %46 : vector<256xf32> to vector<1x256xf32>
    %cst_30 = arith.constant 5.000000e-01 : f32
    %48 = vector.broadcast %cst_30 : f32 to vector<1x256xf32>
    %49 = arith.mulf %47, %48 : vector<1x256xf32>
    %50 = arith.mulf %43, %43 : vector<2x256xf32>
    %cst_31 = arith.constant dense<0.000000e+00> : vector<256xf32>
    %51 = vector.multi_reduction <add>, %50, %cst_31 [0] : vector<2x256xf32> to vector<256xf32>
    %52 = vector.shape_cast %51 : vector<256xf32> to vector<1x256xf32>
    %cst_32 = arith.constant 5.000000e-01 : f32
    %53 = vector.broadcast %cst_32 : f32 to vector<1x256xf32>
    %54 = arith.mulf %52, %53 : vector<1x256xf32>
    %55 = arith.mulf %49, %49 : vector<1x256xf32>
    %56 = arith.subf %54, %55 : vector<1x256xf32>
    %57 = vector.broadcast %49 : vector<1x256xf32> to vector<2x256xf32>
    %58 = arith.subf %43, %57 : vector<2x256xf32>
    %cst_33 = arith.constant 9.99999974E-6 : f32
    %59 = vector.broadcast %cst_33 : f32 to vector<1x256xf32>
    %60 = arith.addf %56, %59 : vector<1x256xf32>
    %61 = math.rsqrt %60 : vector<1x256xf32>
    %62 = vector.broadcast %61 : vector<1x256xf32> to vector<2x256xf32>
    %63 = arith.mulf %58, %62 : vector<2x256xf32>
    %64 = vector.broadcast %44 : vector<1x256xf32> to vector<2x256xf32>
    %65 = arith.mulf %63, %64 : vector<2x256xf32>
    %66 = vector.broadcast %45 : vector<1x256xf32> to vector<2x256xf32>
    %67 = arith.addf %65, %66 : vector<2x256xf32>
    %cst_34 = arith.constant 0.000000e+00 : f32
    %68 = vector.broadcast %cst_34 : f32 to vector<2x256xf32>
    %69 = arith.maximumf %67, %68 : vector<2x256xf32>
    %70 = arith.truncf %69 : vector<2x256xf32> to vector<2x256xbf16>
    %c0_35 = arith.constant 0 : index
    %c0_36 = arith.constant 0 : index
    %71 = vector.load %arg11[%c0_35, %c0_36] : memref<256x16xbf16, #tpu.memory_space<vmem>>, vector<256x16xbf16>
    %cst_37 = arith.constant dense<0.000000e+00> : vector<2x16xf32>
    %72 = tpu.matmul %70, %71, %cst_37 {dimension_numbers = #tpu.dot_dimension_numbers<[1], [0], [0], [1], [0, 0, 1, 1], [], []>} : vector<2x256xbf16>, vector<256x16xbf16>, vector<2x16xf32> -> vector<2x16xf32>
    %c0_38 = arith.constant 0 : index
    %c0_39 = arith.constant 0 : index
    %73 = vector.load %arg12[%c0_38, %c0_39] : memref<1x16xf32, #tpu.memory_space<vmem>>, vector<1x16xf32>
    %74 = vector.broadcast %73 : vector<1x16xf32> to vector<2x16xf32>
    %75 = arith.addf %72, %74 : vector<2x16xf32>
    %c0_40 = arith.constant 0 : index
    %c0_41 = arith.constant 0 : index
    %76 = vector.load %arg13[%c0_40, %c0_41] : memref<256x16xbf16, #tpu.memory_space<vmem>>, vector<256x16xbf16>
    %cst_42 = arith.constant dense<0.000000e+00> : vector<2x16xf32>
    %77 = tpu.matmul %70, %76, %cst_42 {dimension_numbers = #tpu.dot_dimension_numbers<[1], [0], [0], [1], [0, 0, 1, 1], [], []>} : vector<2x256xbf16>, vector<256x16xbf16>, vector<2x16xf32> -> vector<2x16xf32>
    %c0_43 = arith.constant 0 : index
    %c0_44 = arith.constant 0 : index
    %78 = vector.load %arg14[%c0_43, %c0_44] : memref<1x16xf32, #tpu.memory_space<vmem>>, vector<1x16xf32>
    %79 = vector.broadcast %78 : vector<1x16xf32> to vector<2x16xf32>
    %80 = arith.addf %77, %79 : vector<2x16xf32>
    %cst_45 = arith.constant 5.000000e-01 : f32
    %81 = vector.broadcast %cst_45 : f32 to vector<2x16xf32>
    %82 = arith.mulf %81, %80 : vector<2x16xf32>
    %83 = math.exp %82 : vector<2x16xf32>
    %c0_46 = arith.constant 0 : index
    %c0_47 = arith.constant 0 : index
    %84 = vector.load %arg17[%c0_46, %c0_47] : memref<2x16xf32, #tpu.memory_space<vmem>>, vector<2x16xf32>
    tpu.vector_store %arg17[%c0_46, %c0_47], %75 {strides = array<i32>} : memref<2x16xf32, #tpu.memory_space<vmem>>, vector<2x16xf32>,
    %c0_48 = arith.constant 0 : index
    %c0_49 = arith.constant 0 : index
    %85 = vector.load %arg18[%c0_48, %c0_49] : memref<2x16xf32, #tpu.memory_space<vmem>>, vector<2x16xf32>
    tpu.vector_store %arg18[%c0_48, %c0_49], %80 {strides = array<i32>} : memref<2x16xf32, #tpu.memory_space<vmem>>, vector<2x16xf32>,
    %c0_50 = arith.constant 0 : index
    %c0_51 = arith.constant 0 : index
    %86 = vector.load %arg19[%c0_50, %c0_51] : memref<2x16xf32, #tpu.memory_space<vmem>>, vector<2x16xf32>
    tpu.vector_store %arg19[%c0_50, %c0_51], %83 {strides = array<i32>} : memref<2x16xf32, #tpu.memory_space<vmem>>, vector<2x16xf32>,
    %c0_52 = arith.constant 0 : index
    %c0_53 = arith.constant 0 : index
    %87 = vector.load %arg15[%c0_52, %c0_53] : memref<2x16xf32, #tpu.memory_space<vmem>>, vector<2x16xf32>
    %88 = arith.mulf %87, %83 : vector<2x16xf32>
    %89 = arith.addf %88, %75 : vector<2x16xf32>
    %c0_54 = arith.constant 0 : index
    %c0_55 = arith.constant 0 : index
    %90 = vector.load %arg16[%c0_54, %c0_55] : memref<2x16xf32, #tpu.memory_space<vmem>>, vector<2x16xf32>
    tpu.vector_store %arg16[%c0_54, %c0_55], %89 {strides = array<i32>} : memref<2x16xf32, #tpu.memory_space<vmem>>, vector<2x16xf32>,
    return
  }
}

</mosaic_0001>

<bundles_post_ra>
// kernel: tpu_custom_call.1
= control target key start
LH: loop header
LB: loop body
LE: loop exit
PB: predicated region body
PF: predicated region fallthrough
CT: control target
= control target key end

     0   :  { %s2212_s0 = inlined_call_operand.vmem [shape: f32[2,16], index: 0, kind: input, shape index: {}]   ;;  %s2213_s1 = inlined_call_operand.vmem [shape: f32[2,8], index: 1, kind: input, shape index: {}]   ;;  %s2214_s2 = inlined_call_operand.vmem [shape: bf16[16,512], index: 2, kind: input, shape index: {}]   ;;  %s2215_s3 = inlined_call_operand.vmem [shape: bf16[8,512], index: 3, kind: input, shape index: {}]   ;;  %s2216_s4 = inlined_call_operand.vmem [shape: f32[1,512], index: 4, kind: input, shape index: {}]   ;;  %s2217_s5 = inlined_call_operand.vmem [shape: f32[1,512], index: 5, kind: input, shape index: {}]   ;;  %s2218_s6 = inlined_call_operand.vmem [shape: f32[1,512], index: 6, kind: input, shape index: {}]   ;;  %s2219_s7 = inlined_call_operand.hbm [shape: bf16[512,256], index: 7, kind: input, shape index: {}]   ;;  %s2220_s8 = inlined_call_operand.vmem [shape: f32[1,256], index: 8, kind: input, shape index: {}]   ;;  %s2221_s9 = inlined_call_operand.vmem [shape: f32[1,256], index: 9, kind: input, shape index: {}]   ;;  %s2222_s10 = inlined_call_operand.vmem [shape: f32[1,256], index: 10, kind: input, shape index: {}]   ;;  %s2223_s11 = inlined_call_operand.vmem [shape: bf16[256,16], index: 11, kind: input, shape index: {}]   ;;  %s2224_s12 = inlined_call_operand.vmem [shape: f32[1,16], index: 12, kind: input, shape index: {}]   ;;  %s2225_s13 = inlined_call_operand.vmem [shape: bf16[256,16], index: 13, kind: input, shape index: {}]   ;;  %s2226_s14 = inlined_call_operand.vmem [shape: f32[1,16], index: 14, kind: input, shape index: {}]   ;;  %s2227_s15 = inlined_call_operand.vmem [shape: f32[2,16], index: 15, kind: input, shape index: {}]   ;;  %s2228_s16 = inlined_call_operand.hbm [shape: f32[2,16], index: 16, kind: output, shape index: {0}]   ;;  %s2229_s17 = inlined_call_operand.hbm [shape: f32[2,16], index: 17, kind: output, shape index: {1}]   ;;  %s2230_s18 = inlined_call_operand.hbm [shape: f32[2,16], index: 18, kind: output, shape index: {2}]   ;;  %s2231_s19 = inlined_call_operand.hbm [shape: f32[2,16], index: 19, kind: output, shape index: {3}]  }
   0x1   :  { %2234 = sst [smem:[#allocation15_spill]] %s2212_s0 }
   0x2   :  { %2235 = sst [smem:[#allocation16_spill]] %s2213_s1 }
   0x3   :  { %2236 = sst [smem:[#allocation17_spill]] %s2214_s2 }
   0x4   :  { %2237 = sst [smem:[#allocation18_spill]] %s2215_s3 }
   0x5   :  { %25 = vsyncpa [#allocation3], 0 }
   0x6   :  { %26 = vsyncpa [#allocation4], 0 }
   0x7   :  { %27 = vsyncpa [#allocation7], 0 }
   0x8   :  { %28 = vsyncpa [#allocation10], 0  ;;  %s1876_s0 = smov [#allocation2]  }
   0x9   :  { %s48_s30 = sshll.u32 %s1876_s0, 4  ;;  %s49_s30 = int_to_ptr.vmem [resolvable:$true] %s48_s30 }
   0xa   :  { %s1776_s20 = scalar_lea.vmem %s49_s30, 8192  ;;  %p1781_p1 = scmp.lt.s32.totalorder %s49_s30, %s49_s30 }
   0xb   :  { %p1777_p0 = scmp.ne.s32.totalorder %s49_s30, %s1776_s20  ;;  %p1782_p2 = scmp.lt.s32.totalorder %s1776_s20, %s1776_s20 }
   0xd   :  { %p1783_p3 = por %p1782_p2, %p1781_p1 }
   0xf   :  { %p1784_p4 = pnand %p1783_p3, %p1777_p0 }
  0x11   :  { %1787 = shalt.err (!%p1784_p4)
}
  0x12   :  { %s1877_s21 = smov 128   ;;  %s1878_s1 = smov 8  }
  0x13   :  { %54 = dma.hbm_to_vmem [thread:$0]  %s2219_s7, 8192, %s49_s30, [#allocation3], %s1877_s21, %s1877_s21, %s1878_s1  }
  0x14   :  { %1868 = dma.done.wait [#allocation3], 8192  }
  0x15   :  { %1869 = vsyncadd [#allocation3], 4294959104  ;;  %v1879_v0 = vmov 0   ;;  %s2238_s25 = sld [smem:[#allocation18_spill]]  ;;  %vm99_vm0 = vcmask 1043456   ;;  %vm95_vm1 = vcmask 64512  }
  0x16   :  { %144 = vmatprep.mubr.bf16.mxu0 %v1879_v0  ;;  %185 = vmatprep.mubr.bf16.mxu1 %v1879_v0  ;;  %s2239_s29 = sld [smem:[#allocation16_spill]]  ;;  %v1628_v16 = vld [vmem:[#allocation2 + $0x74] ss:$8 sps:$4 sm:$0xff]   ;;  %v1626_v18 = vld [vmem:[#allocation2 + $0x70] ss:$8 sps:$4 sm:$0xff]   ;;  %vm214_vm2 = vcmask 130048  }
  0x17   :  { %s2240_s30 = sld [smem:[#allocation17_spill]]  ;;  %v1631_v17 = vld [vmem:[#allocation2 + $0x174] ss:$8 sps:$4 sm:$0xff]   ;;  %v1629_v19 = vld [vmem:[#allocation2 + $0x170] ss:$8 sps:$4 sm:$0xff]   ;;  %vm328_vm3 = vcmask 1041408  }
  0x18   :  { %s2241_s3 = sld [smem:[#allocation15_spill]]  ;;  %v1634_v21 = vld [vmem:[#allocation2 + $0x64] ss:$8 sps:$4 sm:$0xff]   ;;  %v1632_v23 = vld [vmem:[#allocation2 + $0x60] ss:$8 sps:$4 sm:$0xff]   ;;  %s1881_s27 = smov [#allocation8]  }
  0x19   :  { %v1637_v22 = vld [vmem:[#allocation2 + $0x164] ss:$8 sps:$4 sm:$0xff]   ;;  %v1635_v24 = vld [vmem:[#allocation2 + $0x160] ss:$8 sps:$4 sm:$0xff]   ;;  %v1640_v25 = vld [vmem:[#allocation2 + $0x54] ss:$8 sps:$4 sm:$0xff]  }
  0x1a   :  { %v1643_v26 = vld [vmem:[#allocation2 + $0x154] ss:$8 sps:$4 sm:$0xff]   ;;  %v1638_v27 = vld [vmem:[#allocation2 + $0x50] ss:$8 sps:$4 sm:$0xff]   ;;  %v1646_v29 = vld [vmem:[#allocation2 + $0x44] ss:$8 sps:$4 sm:$0xff]  }
  0x1b   :  { %v83_v1 = vld [vmem:[%s2238_s25] sm:$0xff]  ;;  %v84_v2 = vld [vmem:[%s2238_s25 + $0x8] sm:$0xff]  ;;  %v1641_v28 = vld [vmem:[#allocation2 + $0x150] ss:$8 sps:$4 sm:$0xff]   ;;  %vm1388_vm4 = vcmask 123904  }
  0x1c   :  { %v81_v3 = vld [vmem:[%s2239_s29] sm:$0x3]  ;;  %v1453_v4 = vcombine.high %v83_v1, %v83_v1  ;;  %v1455_v5 = vcombine.high %v84_v2, %v84_v2  ;;  %v1452_v6 = vcombine.low %v83_v1, %v83_v1  ;;  %v1454_v7 = vcombine.low %v84_v2, %v84_v2  ;;  %v1649_v30 = vld [vmem:[#allocation2 + $0x144] ss:$8 sps:$4 sm:$0xff]   ;;  %v1652_v33 = vld [vmem:[#allocation2 + $0x34] ss:$8 sps:$4 sm:$0xff]  }
  0x1d   :  { %v1622_v8 = vld [vmem:[%s2240_s30 + $0x4] ss:$16 sps:$4 sm:$0xff]   ;;  %v82_v11 = vpack.c.bf16 %v81_v3, %v81_v3  ;;  %v1620_v12 = vld [vmem:[%s2240_s30] ss:$16 sps:$4 sm:$0xff]   ;;  %v1625_v13 = vld [vmem:[%s2240_s30 + $0xc] ss:$16 sps:$4 sm:$0xff]  }
  0x1e   :  { %1456 = vmatprep.subr.msk.bf16.mxu0 %vm99_vm0, %v1453_v4  ;;  %1458 = vmatprep.subr.msk.bf16.mxu1 %vm99_vm0, %v1455_v5  ;;  %v101_v9 = vsel %vm99_vm0, %v1452_v6, 0  ;;  %v107_v10 = vsel %vm99_vm0, %v1454_v7, 0  ;;  %v1623_v14 = vld [vmem:[%s2240_s30 + $0x8] ss:$16 sps:$4 sm:$0xff]   ;;  %v75_v15 = vld [vmem:[%s2241_s3] sm:$0x3] }
  0x1f   :  { %127 = vmatpush1.bf16.msra.mxu0 %v101_v9  ;;  %168 = vmatpush1.bf16.msra.mxu1 %v107_v10  ;;  %v76_v20 = vpack.c.bf16 %v75_v15, %v75_v15  ;;  %v1644_v31 = vld [vmem:[#allocation2 + $0x40] ss:$8 sps:$4 sm:$0xff]   ;;  %v1655_v34 = vld [vmem:[#allocation2 + $0x134] ss:$8 sps:$4 sm:$0xff]   ;;  %v1650_v35 = vld [vmem:[#allocation2 + $0x30] ss:$8 sps:$4 sm:$0xff]  }
  0x20   :  { %232 = vmatprep.subr.bf16.mxu0 %v1622_v8  ;;  %273 = vmatprep.subr.bf16.mxu1 %v1625_v13  ;;  %v1647_v32 = vld [vmem:[#allocation2 + $0x140] ss:$8 sps:$4 sm:$0xff]   ;;  %v1653_v36 = vld [vmem:[#allocation2 + $0x130] ss:$8 sps:$4 sm:$0xff]   ;;  %v1658_v37 = vld [vmem:[#allocation2 + $0x24] ss:$8 sps:$4 sm:$0xff]  }
  0x21   :  { %v1661_v38 = vld [vmem:[#allocation2 + $0x124] ss:$8 sps:$4 sm:$0xff]   ;;  %v1656_v39 = vld [vmem:[#allocation2 + $0x20] ss:$8 sps:$4 sm:$0xff]   ;;  %v1664_v41 = vld [vmem:[#allocation2 + $0x14] ss:$8 sps:$4 sm:$0xff]  }
  0x22   :  { %1457 = vmatmul.mubr.msk.bf16.vlgmr.msra.gmra.mxu0 %vm95_vm1, %v82_v11  ;;  %1459 = vmatmul.mubr.msk.bf16.vlgmr.msra.gmra.mxu1 %vm95_vm1, %v82_v11  ;;  %v1659_v40 = vld [vmem:[#allocation2 + $0x120] ss:$8 sps:$4 sm:$0xff]   ;;  %v1667_v42 = vld [vmem:[#allocation2 + $0x114] ss:$8 sps:$4 sm:$0xff]   ;;  %v1662_v43 = vld [vmem:[#allocation2 + $0x10] ss:$8 sps:$4 sm:$0xff]  }
  0x23   :  { %233 = vmatpush1.bf16.msra.mxu0 %v1620_v12  ;;  %274 = vmatpush1.bf16.msra.mxu1 %v1623_v14  ;;  %v1665_v44 = vld [vmem:[#allocation2 + $0x110] ss:$8 sps:$4 sm:$0xff]   ;;  %v1670_v45 = vld [vmem:[#allocation2 + $0x4] ss:$8 sps:$4 sm:$0xff]   ;;  %v1668_v47 = vld [vmem:[#allocation2] ss:$8 sps:$4 sm:$0xff]  }
  0x24   :  { %250 = vmatprep.mubr.bf16.mxu0 %v1879_v0  ;;  %291 = vmatprep.mubr.bf16.mxu1 %v1879_v0  ;;  %v1673_v46 = vld [vmem:[#allocation2 + $0x104] ss:$8 sps:$4 sm:$0xff]   ;;  %v1671_v48 = vld [vmem:[#allocation2 + $0x100] ss:$8 sps:$4 sm:$0xff]   ;;  %v1676_v49 = vld [vmem:[#allocation2 + $0xf4] ss:$8 sps:$4 sm:$0xff]  }
  0x25   :  { %875 = vmatprep.subr.bf16.mxu0 %v1628_v16  ;;  %916 = vmatprep.subr.bf16.mxu1 %v1631_v17  ;;  %v1679_v50 = vld [vmem:[#allocation2 + $0x1f4] ss:$8 sps:$4 sm:$0xff]   ;;  %v1674_v51 = vld [vmem:[#allocation2 + $0xf0] ss:$8 sps:$4 sm:$0xff]   ;;  %v1682_v53 = vld [vmem:[#allocation2 + $0xe4] ss:$8 sps:$4 sm:$0xff]   ;;  %v302_v17 = vlaneseq }
  0x26   :  { %v1677_v52 = vld [vmem:[#allocation2 + $0x1f0] ss:$8 sps:$4 sm:$0xff]   ;;  %v1685_v54 = vld [vmem:[#allocation2 + $0x1e4] ss:$8 sps:$4 sm:$0xff]   ;;  %v1680_v55 = vld [vmem:[#allocation2 + $0xe0] ss:$8 sps:$4 sm:$0xff]  }
  0x27   :  { %v1683_v56 = vld [vmem:[#allocation2 + $0x1e0] ss:$8 sps:$4 sm:$0xff]   ;;  %v1688_v57 = vld [vmem:[#allocation2 + $0xd4] ss:$8 sps:$4 sm:$0xff]   ;;  %v1686_v59 = vld [vmem:[#allocation2 + $0xd0] ss:$8 sps:$4 sm:$0xff]  }
  0x28   :  { %v1691_v58 = vld [vmem:[#allocation2 + $0x1d4] ss:$8 sps:$4 sm:$0xff]   ;;  %v1689_v60 = vld [vmem:[#allocation2 + $0x1d0] ss:$8 sps:$4 sm:$0xff]   ;;  %v1694_v61 = vld [vmem:[#allocation2 + $0xc4] ss:$8 sps:$4 sm:$0xff]  }
  0x29   :  { %v1697_v62 = vld [vmem:[#allocation2 + $0x1c4] ss:$8 sps:$4 sm:$0xff]   ;;  %v1692_v63 = vld [vmem:[#allocation2 + $0xc0] ss:$8 sps:$4 sm:$0xff]   ;;  %v1700_v1 = vld [vmem:[#allocation2 + $0xb4] ss:$8 sps:$4 sm:$0xff]  }
  0x2a   :  { %1464 = vmatmul.mubr.msk.bf16.vlgmr.msra.gmra.mxu0 %vm214_vm2, %v76_v20  ;;  %1465 = vmatmul.mubr.msk.bf16.vlgmr.msra.gmra.mxu1 %vm214_vm2, %v76_v20  ;;  %v1695_v0 = vld [vmem:[#allocation2 + $0x1c0] ss:$8 sps:$4 sm:$0xff]   ;;  %v1703_v2 = vld [vmem:[#allocation2 + $0x1b4] ss:$8 sps:$4 sm:$0xff]   ;;  %v1698_v3 = vld [vmem:[#allocation2 + $0xb0] ss:$8 sps:$4 sm:$0xff]  }
  0x2b   :  { %876 = vmatpush1.bf16.msra.mxu0 %v1626_v18  ;;  %917 = vmatpush1.bf16.msra.mxu1 %v1629_v19  ;;  %v1701_v4 = vld [vmem:[#allocation2 + $0x1b0] ss:$8 sps:$4 sm:$0xff]   ;;  %v1706_v5 = vld [vmem:[#allocation2 + $0xa4] ss:$8 sps:$4 sm:$0xff]   ;;  %v1704_v6 = vld [vmem:[#allocation2 + $0xa0] ss:$8 sps:$4 sm:$0xff]  }
  0x2c   :  { %877 = vmatprep.subr.bf16.mxu0 %v1634_v21  ;;  %918 = vmatprep.subr.bf16.mxu1 %v1637_v22  ;;  %v1707_v7 = vld [vmem:[#allocation2 + $0x1a0] ss:$8 sps:$4 sm:$0xff]   ;;  %v1709_v8 = vld [vmem:[#allocation2 + $0x1a4] ss:$8 sps:$4 sm:$0xff]   ;;  %v1712_v9 = vld [vmem:[#allocation2 + $0x94] ss:$8 sps:$4 sm:$0xff]  }
  0x2d   :  { %v1715_v10 = vld [vmem:[#allocation2 + $0x194] ss:$8 sps:$4 sm:$0xff]   ;;  %v1710_v11 = vld [vmem:[#allocation2 + $0x90] ss:$8 sps:$4 sm:$0xff]   ;;  %v1718_v13 = vld [vmem:[#allocation2 + $0x84] ss:$8 sps:$4 sm:$0xff]  }
  0x2e   :  { %v1713_v12 = vld [vmem:[#allocation2 + $0x190] ss:$8 sps:$4 sm:$0xff]   ;;  %v1721_v14 = vld [vmem:[#allocation2 + $0x184] ss:$8 sps:$4 sm:$0xff]   ;;  %v1716_v15 = vld [vmem:[#allocation2 + $0x80] ss:$8 sps:$4 sm:$0xff]  }
  0x2f   :  { %878 = vmatpush1.bf16.msra.mxu0 %v1632_v23  ;;  %919 = vmatpush1.bf16.msra.mxu1 %v1635_v24  ;;  %v1719_v16 = vld [vmem:[#allocation2 + $0x180] ss:$8 sps:$4 sm:$0xff]   ;;  %v303_v18 = vshrl.u32 %v302_v17, 7  ;;  %s1880_s3 = smov [#allocation6]  }
  0x30   :  { %879 = vmatprep.subr.bf16.mxu0 %v1640_v25  ;;  %920 = vmatprep.subr.bf16.mxu1 %v1643_v26  ;;  %s1412_s26 = sshll.u32 %s1880_s3, 4  ;;  %s1413_s26 = int_to_ptr.vmem [resolvable:$true] %s1412_s26 }
  0x31   :  { %v2011_v23 = vsub.s32 0, %v303_v18  ;;  %v2013_v24 = vsub.s32 2, %v303_v18  ;;  %p1793_p6 = scmp.lt.s32.totalorder %s1413_s26, %s1413_s26 }
  0x33   :  { %880 = vmatpush1.bf16.msra.mxu0 %v1638_v27  ;;  %921 = vmatpush1.bf16.msra.mxu1 %v1641_v28  ;;  %v300_v27 = vld [vmem:[%s2216_s4] sm:$0xf]  ;;  %s1422_s4 = sshll.u32 %s1881_s27, 4  ;;  %s1423_s4 = int_to_ptr.vmem [resolvable:$true] %s1422_s4 }
  0x34   :  { %881 = vmatprep.subr.bf16.mxu0 %v1646_v29  ;;  %922 = vmatprep.subr.bf16.mxu1 %v1649_v30  ;;  %v2018_v30 = vsub.s32 1, %v303_v18 }
  0x37   :  { %882 = vmatpush1.bf16.msra.mxu0 %v1644_v31  ;;  %923 = vmatpush1.bf16.msra.mxu1 %v1647_v32  ;;  %v2020_v31 = vsub.s32 3, %v303_v18  ;;  %v305_v32 = vrot.slane %v300_v27, %v2011_v23 }
  0x38   :  { %883 = vmatprep.subr.bf16.mxu0 %v1652_v33  ;;  %924 = vmatprep.subr.bf16.mxu1 %v1655_v34  ;;  %v313_v33 = vrot.slane %v300_v27, %v2013_v24 }
  0x3b   :  { %884 = vmatpush1.bf16.msra.mxu0 %v1650_v35  ;;  %925 = vmatpush1.bf16.msra.mxu1 %v1653_v36 }
  0x3c   :  { %885 = vmatprep.subr.bf16.mxu0 %v1658_v37  ;;  %926 = vmatprep.subr.bf16.mxu1 %v1661_v38 }
  0x3f   :  { %886 = vmatpush1.bf16.msra.mxu0 %v1656_v39  ;;  %927 = vmatpush1.bf16.msra.mxu1 %v1659_v40  ;;  %v309_v39 = vrot.slane %v300_v27, %v2018_v30 }
  0x40   :  { %887 = vmatprep.subr.bf16.mxu0 %v1664_v41  ;;  %928 = vmatprep.subr.bf16.mxu1 %v1667_v42  ;;  %v317_v41 = vrot.slane %v300_v27, %v2020_v31 }
  0x43   :  { %888 = vmatpush1.bf16.msra.mxu0 %v1662_v43  ;;  %929 = vmatpush1.bf16.msra.mxu1 %v1665_v44 }
  0x44   :  { %889 = vmatprep.subr.bf16.mxu0 %v1670_v45  ;;  %930 = vmatprep.subr.bf16.mxu1 %v1673_v46 }
  0x47   :  { %890 = vmatpush1.bf16.msra.mxu0 %v1668_v47  ;;  %931 = vmatpush1.bf16.msra.mxu1 %v1671_v48 }
  0x48   :  { %891 = vmatprep.subr.bf16.mxu0 %v1676_v49  ;;  %932 = vmatprep.subr.bf16.mxu1 %v1679_v50 }
  0x4b   :  { %892 = vmatpush2.bf16.msra.mxu0 %v1674_v51  ;;  %933 = vmatpush2.bf16.msra.mxu1 %v1677_v52 }
  0x4c   :  { %893 = vmatprep.subr.bf16.mxu0 %v1682_v53  ;;  %934 = vmatprep.subr.bf16.mxu1 %v1685_v54 }
  0x4f   :  { %894 = vmatpush2.bf16.msra.mxu0 %v1680_v55  ;;  %935 = vmatpush2.bf16.msra.mxu1 %v1683_v56 }
  0x50   :  { %895 = vmatprep.subr.bf16.mxu0 %v1688_v57  ;;  %936 = vmatprep.subr.bf16.mxu1 %v1691_v58 }
  0x53   :  { %896 = vmatpush2.bf16.msra.mxu0 %v1686_v59  ;;  %937 = vmatpush2.bf16.msra.mxu1 %v1689_v60 }
  0x54   :  { %897 = vmatprep.subr.bf16.mxu0 %v1694_v61  ;;  %938 = vmatprep.subr.bf16.mxu1 %v1697_v62 }
  0x57   :  { %898 = vmatpush2.bf16.msra.mxu0 %v1692_v63  ;;  %939 = vmatpush2.bf16.msra.mxu1 %v1695_v0 }
  0x58   :  { %899 = vmatprep.subr.bf16.mxu0 %v1700_v1  ;;  %940 = vmatprep.subr.bf16.mxu1 %v1703_v2 }
  0x5b   :  { %900 = vmatpush2.bf16.msra.mxu0 %v1698_v3  ;;  %941 = vmatpush2.bf16.msra.mxu1 %v1701_v4 }
  0x5c   :  { %901 = vmatprep.subr.bf16.mxu0 %v1706_v5  ;;  %942 = vmatprep.subr.bf16.mxu1 %v1709_v8 }
  0x5f   :  { %902 = vmatpush2.bf16.msra.mxu0 %v1704_v6  ;;  %943 = vmatpush2.bf16.msra.mxu1 %v1707_v7 }
  0x60   :  { %903 = vmatprep.subr.bf16.mxu0 %v1712_v9  ;;  %944 = vmatprep.subr.bf16.mxu1 %v1715_v10 }
  0x63   :  { %904 = vmatpush2.bf16.msra.mxu0 %v1710_v11  ;;  %945 = vmatpush2.bf16.msra.mxu1 %v1713_v12 }
  0x64   :  { %905 = vmatprep.subr.bf16.mxu0 %v1718_v13  ;;  %946 = vmatprep.subr.bf16.mxu1 %v1721_v14 }
  0x67   :  { %906 = vmatpush2.bf16.msra.mxu0 %v1716_v15  ;;  %947 = vmatpush2.bf16.msra.mxu1 %v1719_v16 }
  0xe2   :  { %v146_v19 = vpop.f32.mrf.mxu0  ;;  %v187_v20 = vpop.f32.mrf.mxu1 }
  0xe4   :  { %v148_v21 = vpop.f32.mrf.mxu0  ;;  %v189_v22 = vpop.f32.mrf.mxu1 }
  0xe6   :  { %v150_v25 = vpop.f32.mrf.mxu0  ;;  %v191_v26 = vpop.f32.mrf.mxu1 }
  0xe8   :  { %v151_v28 = vpop.f32.mrf.mxu0  ;;  %v192_v29 = vpop.f32.mrf.mxu1 }
  0xea   :  { %v252_v34 = vpop.f32.mrf.mxu0  ;;  %v293_v35 = vpop.f32.mrf.mxu1 }
  0xeb   :  { %v253_v36 = vadd.f32 %v252_v34, %v146_v19  ;;  %v294_v37 = vadd.f32 %v293_v35, %v187_v20 }
  0xec   :  { %v254_v38 = vpop.f32.mrf.mxu0  ;;  %v295_v40 = vpop.f32.mrf.mxu1 }
  0xed   :  { %v2026_v42 = vadd.f32 %v305_v32, %v253_v36  ;;  %v2028_v43 = vadd.f32 %v313_v33, %v294_v37  ;;  %v255_v44 = vadd.f32 %v254_v38, %v148_v21  ;;  %v296_v45 = vadd.f32 %v295_v40, %v189_v22 }
  0xee   :  { %v256_v46 = vpop.f32.mrf.mxu0  ;;  %v297_v47 = vpop.f32.mrf.mxu1 }
  0xef   :  { %v329_v48 = vsel %vm328_vm3, %v2026_v42, 0.0  ;;  %v361_v49 = vmul.f32 %v2026_v42, %v2026_v42  ;;  %v343_v50 = vsel %vm328_vm3, %v2028_v43, 0.0  ;;  %v363_v51 = vmul.f32 %v2028_v43, %v2028_v43 }
  0xf0   :  { %v330_v52 = vrot.slane %v329_v48, 4  ;;  %v344_v53 = vrot.slane %v343_v50, 4  ;;  %v2038_v54 = vadd.f32 %v309_v39, %v255_v44  ;;  %v2040_v55 = vadd.f32 %v317_v41, %v296_v45  ;;  %v257_v56 = vpop.f32.mrf.mxu0  ;;  %v298_v57 = vpop.f32.mrf.mxu1 }
  0xf1   :  { %v365_v58 = vsel %vm328_vm3, %v361_v49, 0.0  ;;  %v379_v59 = vsel %vm328_vm3, %v363_v51, 0.0 }
  0xf2   :  { %v331_v60 = vadd.f32 %v330_v52, %v329_v48  ;;  %v366_v61 = vrot.slane %v365_v58, 4  ;;  %v345_v62 = vadd.f32 %v344_v53, %v343_v50  ;;  %v380_v63 = vrot.slane %v379_v59, 4 }
  0xf3   :  { %v336_v0 = vsel %vm328_vm3, %v2038_v54, 0.0  ;;  %v362_v1 = vmul.f32 %v2038_v54, %v2038_v54  ;;  %v350_v2 = vsel %vm328_vm3, %v2040_v55, 0.0  ;;  %v364_v3 = vmul.f32 %v2040_v55, %v2040_v55 }
  0xf4   :  { %v332_v4 = vrot.slane %v331_v60, 2  ;;  %v367_v5 = vadd.f32 %v366_v61, %v365_v58  ;;  %v346_v6 = vrot.slane %v345_v62, 2  ;;  %v381_v7 = vadd.f32 %v380_v63, %v379_v59 }
  0xf5   :  { %v337_v8 = vrot.slane %v336_v0, 4  ;;  %v372_v9 = vsel %vm328_vm3, %v362_v1, 0.0  ;;  %v351_v10 = vrot.slane %v350_v2, 4  ;;  %v386_v11 = vsel %vm328_vm3, %v364_v3, 0.0 }
  0xf6   :  { %v333_v12 = vadd.f32 %v332_v4, %v331_v60  ;;  %v368_v13 = vrot.slane %v367_v5, 2  ;;  %v347_v14 = vadd.f32 %v346_v6, %v345_v62  ;;  %v382_v15 = vrot.slane %v381_v7, 2 }
  0xf7   :  { %v338_v16 = vadd.f32 %v337_v8, %v336_v0  ;;  %v373_v17 = vrot.slane %v372_v9, 4  ;;  %v352_v18 = vadd.f32 %v351_v10, %v350_v2  ;;  %v387_v19 = vrot.slane %v386_v11, 4 }
  0xf8   :  { %v334_v20 = vrot.slane %v333_v12, 1  ;;  %v369_v21 = vadd.f32 %v368_v13, %v367_v5  ;;  %v348_v22 = vrot.slane %v347_v14, 1  ;;  %v383_v25 = vadd.f32 %v382_v15, %v381_v7 }
  0xf9   :  { %v339_v26 = vrot.slane %v338_v16, 2  ;;  %v374_v27 = vadd.f32 %v373_v17, %v372_v9  ;;  %v353_v28 = vrot.slane %v352_v18, 2  ;;  %v388_v29 = vadd.f32 %v387_v19, %v386_v11  ;;  %v327_v17 = vld [vmem:[%s2218_s6] sm:$0xf] }
  0xfa   :  { %v335_v32 = vadd.f32 %v334_v20, %v333_v12  ;;  %v370_v33 = vrot.slane %v369_v21, 1  ;;  %v349_v34 = vadd.f32 %v348_v22, %v347_v14  ;;  %v384_v35 = vrot.slane %v383_v25, 1  ;;  %v326_v12 = vld [vmem:[%s2217_s5] sm:$0xf] }
  0xfb   :  { %v340_v36 = vadd.f32 %v339_v26, %v338_v16  ;;  %v375_v37 = vrot.slane %v374_v27, 2  ;;  %v354_v38 = vadd.f32 %v353_v28, %v352_v18  ;;  %v389_v39 = vrot.slane %v388_v29, 2 }
  0xfc   :  { %v357_v40 = vmul.f32 0.5, %v335_v32  ;;  %v371_v41 = vadd.f32 %v370_v33, %v369_v21  ;;  %v359_v44 = vmul.f32 0.5, %v349_v34  ;;  %v385_v45 = vadd.f32 %v384_v35, %v383_v25 }
  0xfd   :  { %v341_v46 = vrot.slane %v340_v36, 1  ;;  %v376_v47 = vadd.f32 %v375_v37, %v374_v27  ;;  %v355_v48 = vrot.slane %v354_v38, 1  ;;  %v390_v49 = vadd.f32 %v389_v39, %v388_v29 }
  0xfe   :  { %v393_v50 = vmul.f32 0.5, %v371_v41  ;;  %v397_v51 = vmul.f32 %v357_v40, %v357_v40  ;;  %v395_v52 = vmul.f32 0.5, %v385_v45  ;;  %v399_v53 = vmul.f32 %v359_v44, %v359_v44 }
  0xff   :  { %v342_v56 = vadd.f32 %v341_v46, %v340_v36  ;;  %v377_v57 = vrot.slane %v376_v47, 1  ;;  %v356_v59 = vadd.f32 %v355_v48, %v354_v38  ;;  %v391_v60 = vrot.slane %v390_v49, 1 }
 0x100   :  { %v401_v58 = vsub.f32 %v393_v50, %v397_v51  ;;  %v403_v61 = vsub.f32 %v395_v52, %v399_v53  ;;  %v405_v13 = vsub.f32 %v2026_v42, %v357_v40  ;;  %v425_v14 = vrot.slane %v326_v12, %v2011_v23  ;;  %v1723_v51 = vld [vmem:[%s2225_s13 + $0x78] sm:$0xff]  }
 0x101   :  { %v358_v62 = vmul.f32 0.5, %v342_v56  ;;  %v378_v63 = vadd.f32 %v377_v57, %v376_v47  ;;  %v360_v1 = vmul.f32 0.5, %v356_v59  ;;  %v392_v2 = vadd.f32 %v391_v60, %v390_v49  ;;  %v1724_v52 = vld [vmem:[%s2223_s11 + $0x38] sm:$0xff]   ;;  %1586 = vmatprep.subr.bf16.mxu1 %v1723_v51  ;;  %v1726_v56 = vld [vmem:[%s2223_s11 + $0x70] sm:$0xff]   ;;  %v1730_v60 = vld [vmem:[%s2223_s11 + $0x68] sm:$0xff]  }
 0x102   :  { %v409_v0 = vadd.f32 1e-05, %v401_v58  ;;  %v411_v3 = vadd.f32 1e-05, %v403_v61  ;;  %v407_v16 = vsub.f32 %v2028_v43, %v359_v44  ;;  %v433_v18 = vrot.slane %v326_v12, %v2013_v24  ;;  %v1725_v53 = vld [vmem:[%s2225_s13 + $0x38] sm:$0xff]   ;;  %v1727_v57 = vld [vmem:[%s2225_s13 + $0x70] sm:$0xff]  }
 0x103   :  { %v394_v4 = vmul.f32 0.5, %v378_v63  ;;  %v398_v5 = vmul.f32 %v358_v62, %v358_v62  ;;  %v396_v6 = vmul.f32 0.5, %v392_v2  ;;  %v400_v7 = vmul.f32 %v360_v1, %v360_v1  ;;  %v1728_v58 = vld [vmem:[%s2223_s11 + $0x30] sm:$0xff]   ;;  %v1731_v61 = vld [vmem:[%s2225_s13 + $0x68] sm:$0xff]   ;;  %v1736_v2 = vld [vmem:[%s2223_s11 + $0x20] sm:$0xff]  }
 0x104   :  { %1754 = vrsqrt.f32 %v409_v0  ;;  %v450_v25 = vrot.slane %v327_v17, %v2011_v23  ;;  %v406_v26 = vsub.f32 %v2038_v54, %v358_v62  ;;  %v429_v42 = vrot.slane %v326_v12, %v2018_v30  ;;  %v1729_v59 = vld [vmem:[%s2225_s13 + $0x30] sm:$0xff]   ;;  %v1732_v62 = vld [vmem:[%s2223_s11 + $0x28] sm:$0xff]   ;;  %v1734_v0 = vld [vmem:[%s2223_s11 + $0x60] sm:$0xff]  }
 0x105   :  { %1756 = vrsqrt.f32 %v411_v3  ;;  %v402_v8 = vsub.f32 %v394_v4, %v398_v5  ;;  %v404_v9 = vsub.f32 %v396_v6, %v400_v7  ;;  %v458_v28 = vrot.slane %v327_v17, %v2013_v24  ;;  %v1733_v63 = vld [vmem:[%s2225_s13 + $0x28] sm:$0xff]   ;;  %v1737_v3 = vld [vmem:[%s2225_s13 + $0x20] sm:$0xff]   ;;  %v1738_v4 = vld [vmem:[%s2223_s11 + $0x58] sm:$0xff]  }
 0x106   :  { %v408_v29 = vsub.f32 %v2040_v55, %v360_v1  ;;  %v437_v32 = vrot.slane %v326_v12, %v2020_v31  ;;  %v454_v35 = vrot.slane %v327_v17, %v2018_v30  ;;  %v462_v37 = vrot.slane %v327_v17, %v2020_v31  ;;  %v1722_v31 = vld [vmem:[%s2223_s11 + $0x78] sm:$0xff]   ;;  %v1735_v1 = vld [vmem:[%s2225_s13 + $0x60] sm:$0xff]   ;;  %v1746_v12 = vld [vmem:[%s2223_s11 + $0x48] sm:$0xff]  }
 0x107   :  { %v410_v10 = vadd.f32 1e-05, %v402_v8  ;;  %v412_v11 = vadd.f32 1e-05, %v404_v9  ;;  %1564 = vmatprep.subr.bf16.mxu0 %v1722_v31  ;;  %v1739_v5 = vld [vmem:[%s2225_s13 + $0x58] sm:$0xff]   ;;  %v1742_v8 = vld [vmem:[%s2223_s11 + $0x50] sm:$0xff]  }
 0x108   :  { %v1740_v6 = vld [vmem:[%s2223_s11 + $0x18] sm:$0xff]   ;;  %v1743_v9 = vld [vmem:[%s2225_s13 + $0x50] sm:$0xff]   ;;  %v1751_v17 = vld [vmem:[%s2225_s13 + $0x40] sm:$0xff]  }
 0x109   :  { %1758 = vrsqrt.f32 %v410_v10  ;;  %v1741_v7 = vld [vmem:[%s2225_s13 + $0x18] sm:$0xff]   ;;  %v1744_v10 = vld [vmem:[%s2223_s11 + $0x10] sm:$0xff]  }
 0x10a   :  { %1760 = vrsqrt.f32 %v412_v11  ;;  %v1745_v11 = vld [vmem:[%s2225_s13 + $0x10] sm:$0xff]  }
 0x111   :  { %v1755_v15 = vpop.eup %1754 }
 0x112   :  { %v1757_v19 = vpop.eup %1756  ;;  %v417_v20 = vmul.f32 %v1755_v15, %v405_v13  ;;  %v1747_v13 = vld [vmem:[%s2225_s13 + $0x48] sm:$0xff]  }
 0x113   :  { %v419_v21 = vmul.f32 %v1757_v19, %v407_v16  ;;  %v1749_v15 = vld [vmem:[%s2225_s13 + $0x8] sm:$0xff]   ;;  %v1750_v16 = vld [vmem:[%s2223_s11 + $0x40] sm:$0xff]  }
 0x114   :  { %v442_v22 = vmul.f32 %v425_v14, %v417_v20  ;;  %v1748_v14 = vld [vmem:[%s2223_s11 + $0x8] sm:$0xff]   ;;  %v1753_v19 = vld [vmem:[%s2225_s13] sm:$0xff]  }
 0x115   :  { %v444_v27 = vmul.f32 %v433_v18, %v419_v21  ;;  %v1752_v18 = vld [vmem:[%s2223_s11] sm:$0xff]  }
 0x116   :  { %v1759_v43 = vpop.eup %1758  ;;  %v467_v38 = vadd.f32 %v450_v25, %v442_v22  ;;  %v543_v20 = vld [vmem:[%s2220_s8] sm:$0x3] }
 0x117   :  { %v1761_v33 = vpop.eup %1760  ;;  %v418_v34 = vmul.f32 %v1759_v43, %v406_v26  ;;  %v469_v54 = vadd.f32 %v458_v28, %v444_v27  ;;  %v548_v21 = vrot.slane %v543_v20, %v2011_v23  ;;  %v552_v22 = vrot.slane %v543_v20, %v2018_v30 }
 0x118   :  { %v420_v36 = vmul.f32 %v1761_v33, %v408_v29  ;;  %v471_v45 = vmax.f32 %v467_v38, 0.0 }
 0x119   :  { %v443_v39 = vmul.f32 %v429_v42, %v418_v34  ;;  %v473_v46 = vmax.f32 %v469_v54, 0.0 }
 0x11a   :  { %v445_v40 = vmul.f32 %v437_v32, %v420_v36  ;;  %v475_v49 = vpack.c.bf16 %v471_v45, %v471_v45 }
 0x11b   :  { %v468_v41 = vadd.f32 %v454_v35, %v443_v39  ;;  %v477_v50 = vpack.c.bf16 %v473_v46, %v473_v46 }
 0x11c   :  { %v470_v44 = vadd.f32 %v462_v37, %v445_v40 }
 0x11d   :  { %v472_v24 = vmax.f32 %v468_v41, 0.0 }
 0x11e   :  { %v474_v47 = vmax.f32 %v470_v44, 0.0 }
 0x11f   :  { %v476_v55 = vpack.c.bf16 %v472_v24, %v472_v24 }
 0x120   :  { %v478_v48 = vpack.c.bf16 %v474_v47, %v474_v47 }
 0x121   :  { %907 = vmatprep.mubr.bf16.mxu0 %v476_v55 }
 0x122   :  { %948 = vmatprep.mubr.bf16.mxu1 %v478_v48  ;;  %908 = vmatmul.mubr.bf16.vlgmr.msra.gmra.mxu0 %v475_v49 }
 0x123   :  { %949 = vmatmul.mubr.bf16.vlgmr.msra.gmra.mxu1 %v477_v50  ;;  %1565 = vmatpush3.bf16.msra.mxu0 %v1724_v52 }
 0x124   :  { %1587 = vmatpush3.bf16.msra.mxu1 %v1725_v53  ;;  %1566 = vmatprep.subr.bf16.mxu0 %v1726_v56 }
 0x125   :  { %1588 = vmatprep.subr.bf16.mxu1 %v1727_v57 }
 0x127   :  { %1567 = vmatpush3.bf16.msra.mxu0 %v1728_v58 }
 0x128   :  { %1589 = vmatpush3.bf16.msra.mxu1 %v1729_v59  ;;  %1568 = vmatprep.subr.bf16.mxu0 %v1730_v60 }
 0x129   :  { %1590 = vmatprep.subr.bf16.mxu1 %v1731_v61 }
 0x12b   :  { %1569 = vmatpush3.bf16.msra.mxu0 %v1732_v62 }
 0x12c   :  { %1591 = vmatpush3.bf16.msra.mxu1 %v1733_v63  ;;  %1570 = vmatprep.subr.bf16.mxu0 %v1734_v0 }
 0x12d   :  { %1592 = vmatprep.subr.bf16.mxu1 %v1735_v1 }
 0x12f   :  { %1571 = vmatpush3.bf16.msra.mxu0 %v1736_v2 }
 0x130   :  { %1593 = vmatpush3.bf16.msra.mxu1 %v1737_v3  ;;  %1572 = vmatprep.subr.bf16.mxu0 %v1738_v4 }
 0x131   :  { %1594 = vmatprep.subr.bf16.mxu1 %v1739_v5 }
 0x133   :  { %1573 = vmatpush3.bf16.msra.mxu0 %v1740_v6 }
 0x134   :  { %1595 = vmatpush3.bf16.msra.mxu1 %v1741_v7  ;;  %1574 = vmatprep.subr.bf16.mxu0 %v1742_v8 }
 0x135   :  { %1596 = vmatprep.subr.bf16.mxu1 %v1743_v9 }
 0x137   :  { %1575 = vmatpush3.bf16.msra.mxu0 %v1744_v10 }
 0x138   :  { %1597 = vmatpush3.bf16.msra.mxu1 %v1745_v11  ;;  %1576 = vmatprep.subr.bf16.mxu0 %v1746_v12 }
 0x139   :  { %1598 = vmatprep.subr.bf16.mxu1 %v1747_v13  ;;  %v957_v13 = vld [vmem:[%s2221_s9] sm:$0x3] }
 0x13b   :  { %1577 = vmatpush3.bf16.msra.mxu0 %v1748_v14  ;;  %v958_v14 = vld [vmem:[%s2222_s10] sm:$0x3] }
 0x13c   :  { %1599 = vmatpush3.bf16.msra.mxu1 %v1749_v15  ;;  %1578 = vmatprep.subr.bf16.mxu0 %v1750_v16  ;;  %v1009_v16 = vrot.slane %v957_v13, %v2011_v23 }
 0x13d   :  { %1600 = vmatprep.subr.bf16.mxu1 %v1751_v17 }
 0x13f   :  { %1579 = vmatpush3.bf16.msra.mxu0 %v1752_v18 }
 0x140   :  { %1601 = vmatpush3.bf16.msra.mxu1 %v1753_v19  ;;  %v1022_v19 = vrot.slane %v958_v14, %v2011_v23 }
 0x1e2   :  { %v909_v25 = vpop.f32.mrf.mxu0 }
 0x1e3   :  { %v910_v26 = vadd.f32 %v909_v25, %v548_v21  ;;  %v950_v42 = vpop.f32.mrf.mxu1  ;;  %v1013_v21 = vrot.slane %v957_v13, %v2018_v30 }
 0x1e4   :  { %v911_v27 = vpop.f32.mrf.mxu0 }
 0x1e5   :  { %v951_v28 = vadd.f32 %v950_v42, %v910_v26  ;;  %v912_v43 = vadd.f32 %v911_v27, %v552_v22  ;;  %v952_v29 = vpop.f32.mrf.mxu1  ;;  %v1026_v42 = vrot.slane %v958_v14, %v2018_v30  ;;  %v1547_v30 = vld [vmem:[%s2226_s14] ss:$0 sm:$0xff] }
 0x1e6   :  { %v913_v32 = vpop.f32.mrf.mxu0 }
 0x1e7   :  { %v959_v33 = vsel %vm328_vm3, %v951_v28, 0.0  ;;  %v975_v34 = vmul.f32 %v951_v28, %v951_v28  ;;  %v953_v35 = vadd.f32 %v952_v29, %v912_v43  ;;  %v954_v36 = vpop.f32.mrf.mxu1 }
 0x1e8   :  { %v960_v37 = vrot.slane %v959_v33, 4  ;;  %v914_v38 = vpop.f32.mrf.mxu0  ;;  %v1530_v36 = vld [vmem:[%s2224_s12] ss:$0 sm:$0xff]  ;;  %s1788_s12 = scalar_lea.vmem %s1413_s26, 32 }
 0x1e9   :  { %v977_v39 = vsel %vm328_vm3, %v975_v34, 0.0  ;;  %v966_v54 = vsel %vm328_vm3, %v953_v35, 0.0  ;;  %v976_v40 = vmul.f32 %v953_v35, %v953_v35  ;;  %v955_v41 = vpop.f32.mrf.mxu1  ;;  %p1789_p5 = scmp.ne.s32.totalorder %s1413_s26, %s1788_s12  ;;  %p1794_p7 = scmp.lt.s32.totalorder %s1788_s12, %s1788_s12 }
 0x1ea   :  { %v961_v44 = vadd.f32 %v960_v37, %v959_v33  ;;  %v978_v45 = vrot.slane %v977_v39, 4  ;;  %v967_v24 = vrot.slane %v966_v54, 4 }
 0x1eb   :  { %v984_v46 = vsel %vm328_vm3, %v976_v40, 0.0  ;;  %p1795_p8 = por %p1794_p7, %p1793_p6 }
 0x1ec   :  { %v962_v47 = vrot.slane %v961_v44, 2  ;;  %v979_v55 = vadd.f32 %v978_v45, %v977_v39  ;;  %v968_v48 = vadd.f32 %v967_v24, %v966_v54  ;;  %v985_v49 = vrot.slane %v984_v46, 4 }
 0x1ed   :  { %p1796_p9 = pnand %p1795_p8, %p1789_p5 }
 0x1ee   :  { %v963_v50 = vadd.f32 %v962_v47, %v961_v44  ;;  %v980_v31 = vrot.slane %v979_v55, 2  ;;  %v969_v51 = vrot.slane %v968_v48, 2  ;;  %v986_v52 = vadd.f32 %v985_v49, %v984_v46 }
 0x1f0   :  { %v964_v53 = vrot.slane %v963_v50, 1  ;;  %v981_v56 = vadd.f32 %v980_v31, %v979_v55  ;;  %v970_v57 = vadd.f32 %v969_v51, %v968_v48  ;;  %v987_v58 = vrot.slane %v986_v52, 2 }
 0x1f2   :  { %v965_v59 = vadd.f32 %v964_v53, %v963_v50  ;;  %v982_v60 = vrot.slane %v981_v56, 1  ;;  %v971_v61 = vrot.slane %v970_v57, 1  ;;  %v988_v62 = vadd.f32 %v987_v58, %v986_v52 }
 0x1f4   :  { %v973_v63 = vmul.f32 0.5, %v965_v59  ;;  %v983_v0 = vadd.f32 %v982_v60, %v981_v56  ;;  %v972_v1 = vadd.f32 %v971_v61, %v970_v57  ;;  %v989_v2 = vrot.slane %v988_v62, 1 }
 0x1f6   :  { %v991_v3 = vmul.f32 0.5, %v983_v0  ;;  %v993_v4 = vmul.f32 %v973_v63, %v973_v63  ;;  %v974_v5 = vmul.f32 0.5, %v972_v1  ;;  %v990_v6 = vadd.f32 %v989_v2, %v988_v62 }
 0x1f7   :  { %v997_v15 = vsub.f32 %v951_v28, %v973_v63 }
 0x1f8   :  { %v995_v7 = vsub.f32 %v991_v3, %v993_v4  ;;  %v994_v8 = vmul.f32 %v974_v5, %v974_v5  ;;  %v992_v9 = vmul.f32 0.5, %v990_v6  ;;  %v998_v20 = vsub.f32 %v953_v35, %v974_v5 }
 0x1fa   :  { %v999_v10 = vadd.f32 1e-05, %v995_v7  ;;  %v996_v11 = vsub.f32 %v992_v9, %v994_v8 }
 0x1fc   :  { %1762 = vrsqrt.f32 %v999_v10  ;;  %v1000_v12 = vadd.f32 1e-05, %v996_v11 }
 0x1fe   :  { %1764 = vrsqrt.f32 %v1000_v12 }
 0x209   :  { %v1763_v17 = vpop.eup %1762 }
 0x20a   :  { %v1003_v18 = vmul.f32 %v1763_v17, %v997_v15 }
 0x20b   :  { %v1765_v22 = vpop.eup %1764 }
 0x20c   :  { %v1016_v25 = vmul.f32 %v1009_v16, %v1003_v18  ;;  %v1004_v26 = vmul.f32 %v1765_v22, %v998_v20 }
 0x20e   :  { %v1029_v27 = vadd.f32 %v1022_v19, %v1016_v25  ;;  %v1017_v43 = vmul.f32 %v1013_v21, %v1004_v26 }
 0x210   :  { %v1030_v29 = vadd.f32 %v1026_v42, %v1017_v43  ;;  %v1031_v32 = vmax.f32 %v1029_v27, 0.0 }
 0x212   :  { %v1032_v33 = vmax.f32 %v1030_v29, 0.0  ;;  %v1033_v34 = vpack.c.bf16 %v1031_v32, %v1031_v32 }
 0x214   :  { %v1034_v28 = vpack.c.bf16 %v1032_v33, %v1032_v33 }
 0x216   :  { %1202 = vmatprep.mubr.bf16.mxu0 %v1034_v28  ;;  %1377 = vmatprep.mubr.bf16.mxu1 %v1034_v28 }
 0x217   :  { %1203 = vmatmul.mubr.bf16.vlgmr.msra.gmra.mxu0 %v1033_v34  ;;  %1378 = vmatmul.mubr.bf16.vlgmr.msra.gmra.mxu1 %v1033_v34 }
 0x2d7   :  { %v1580_v23 = vpop.f32.mrf.mxu0  ;;  %v1602_v35 = vpop.f32.mrf.mxu1 }
 0x2d9   :  { %v1581_v37 = vpop.f32.mrf.mxu0  ;;  %v1603_v38 = vpop.f32.mrf.mxu1 }
 0x2da   :  { %v1582_v39 = vadd.f32 %v1581_v37, %v1580_v23  ;;  %v1604_v54 = vadd.f32 %v1603_v38, %v1602_v35 }
 0x2db   :  { %v1583_v40 = vpop.f32.mrf.mxu0  ;;  %v1605_v41 = vpop.f32.mrf.mxu1 }
 0x2dc   :  { %v1205_v44 = vadd.f32 %v1582_v39, %v1530_v36  ;;  %v1380_v45 = vadd.f32 %v1604_v54, %v1547_v30 }
 0x2dd   :  { %v1584_v24 = vpop.f32.mrf.mxu0  ;;  %v1606_v46 = vpop.f32.mrf.mxu1 }
 0x2de   :  { %v1385_v47 = vmul.f32 0.5, %v1380_v45  ;;  %1389 = vst.msk [vmem:[#allocation6] sm:$0x3] %vm1388_vm4, %v1205_v44  ;;  %1390 = vst.msk [vmem:[#allocation8] sm:$0x3] %vm1388_vm4, %v1380_v45 }
 0x2df   :  { %1799 = shalt.err (!%p1796_p9)
}
 0x2e0   :  { %1415 = dma.vmem_to_hbm [thread:$0]  %s1413_s26, 32, %s2229_s17, [#allocation7]   ;;  %v1386_v55 = vmul.f32 1.442695, %v1385_v47 }
 0x2e1   :  { %s1808_s29 = scalar_lea.vmem %s1423_s4, 32  ;;  %p1813_p11 = scmp.lt.s32.totalorder %s1423_s4, %s1423_s4 }
 0x2e2   :  { %p1809_p10 = scmp.ne.s32.totalorder %s1423_s4, %s1808_s29  ;;  %p1814_p12 = scmp.lt.s32.totalorder %s1808_s29, %s1808_s29 }
 0x2e4   :  { %p1815_p13 = por %p1814_p12, %p1813_p11 }
 0x2e6   :  { %p1816_p0 = pnand %p1815_p13, %p1809_p10 }
 0x2e8   :  { %1819 = shalt.err (!%p1816_p0)
}
 0x2e9   :  { %1425 = dma.vmem_to_hbm [thread:$0]  %s1423_s4, 32, %s2230_s18, [#allocation7]   ;;  %1766 = vpow2.f32 %v1386_v55  ;;  %v1392_v48 = vld [vmem:[%s2227_s15] sm:$0x3] }
 0x2ea   :  { %s1882_s6 = smov [#allocation9]   ;;  %s1883_s17 = smov [#allocation5]  }
 0x2eb   :  { %s1432_s0 = sshll.u32 %s1882_s6, 4  ;;  %s1402_s21 = sshll.u32 %s1883_s17, 4  ;;  %s1433_s0 = int_to_ptr.vmem [resolvable:$true] %s1432_s0  ;;  %s1403_s21 = int_to_ptr.vmem [resolvable:$true] %s1402_s21 }
 0x2ec   :  { %s1828_s1 = scalar_lea.vmem %s1433_s0, 32  ;;  %p1833_p2 = scmp.lt.s32.totalorder %s1433_s0, %s1433_s0 }
 0x2ed   :  { %p1829_p1 = scmp.ne.s32.totalorder %s1433_s0, %s1828_s1  ;;  %p1834_p3 = scmp.lt.s32.totalorder %s1828_s1, %s1828_s1 }
 0x2ef   :  { %p1835_p4 = por %p1834_p3, %p1833_p2 }
 0x2f1   :  { %p1836_p5 = pnand %p1835_p4, %p1829_p1 }
 0x2f6   :  { %v1767_v49 = vpop.eup %1766 }
 0x2f7   :  { %1391 = vst.msk [vmem:[#allocation9] sm:$0x3] %vm1388_vm4, %v1767_v49  ;;  %v1393_v50 = vmul.f32 %v1767_v49, %v1392_v48 }
 0x2f8   :  { %1839 = shalt.err (!%p1836_p5)
}
 0x2f9   :  { %1435 = dma.vmem_to_hbm [thread:$0]  %s1433_s0, 32, %s2231_s19, [#allocation10]   ;;  %v1394_v31 = vadd.f32 %v1393_v50, %v1205_v44 }
 0x2fa   :  { %s1848_s15 = scalar_lea.vmem %s1403_s21, 32  ;;  %p1853_p7 = scmp.lt.s32.totalorder %s1403_s21, %s1403_s21 }
 0x2fb   :  { %1395 = vst.msk [vmem:[#allocation5] sm:$0x3] %vm1388_vm4, %v1394_v31  ;;  %p1849_p6 = scmp.ne.s32.totalorder %s1403_s21, %s1848_s15  ;;  %p1854_p8 = scmp.lt.s32.totalorder %s1848_s15, %s1848_s15 }
 0x2fd   :  { %p1855_p9 = por %p1854_p8, %p1853_p7 }
 0x2ff   :  { %p1856_p10 = pnand %p1855_p9, %p1849_p6 }
 0x301   :  { %1859 = shalt.err (!%p1856_p10)
}
 0x302   :  { %1405 = dma.vmem_to_hbm [thread:$0]  %s1403_s21, 32, %s2228_s16, [#allocation4]  }
 0x303   :  { %1870 = dma.done.wait [#allocation4], 32  }
 0x304   :  { %1871 = vsyncadd [#allocation4], 4294967264 }
 0x305   :  { %1872 = dma.done.wait [#allocation7], 64  }
 0x306   :  { %1873 = vsyncadd [#allocation7], 4294967232 }
 0x307   :  { %1874 = dma.done.wait [#allocation10], 32  }
 0x308   :  { %1875 = vsyncadd [#allocation10], 4294967264 }
 0x309   :  { %1448 = vsyncpa [#allocation3], 1 }
 0x30a   :  { %1449 = vsyncpa [#allocation4], 1 }
 0x30b   :  { %1450 = vsyncpa [#allocation7], 1 }
 0x30c   :  { %1451 = vsyncpa [#allocation10], 1 }

</bundles_post_ra>
